<compile_context>
chip_gen: v6e
topology: v6e:2x2x1
jax: 0.10.0
libtpu: 0.0.40
codegen_flags: <defaults>
</compile_context>

<pallas_src>
import jax
import jax.numpy as jnp
from jax.experimental import pallas as pl
from jax.experimental.pallas import tpu as pltpu


LANE = 128        # vreg lane width / MXU-friendly feature tile
SUBLANE = 8
NODE_TILE = 128   # node-row / node-col tile size (multiple of 128)
VMEM_LIMIT = 32 * 1024 * 1024   # budget against v7x's 64 MiB physical VMEM


def _round_up(v, m):
    return (v + m - 1) // m * m


def _pad2d(x, rows, cols):
    r, c = x.shape
    return jnp.pad(x, ((0, rows - r), (0, cols - c)))


# -----------------------------------------------------------------------------
# Stage 1:  H = relu( A_hat @ X @ W1 + b1 )
# grid = (node-row tiles i  [parallel],  node-col tiles k  [arbitrary/reduction])
# -----------------------------------------------------------------------------
def gcnconv_kernel(a_ref, x_ref, w1_ref, b1_ref, h_ref, acc_ref):
    k = pl.program_id(1)

    @pl.when(k == 0)
    def _():
        acc_ref[...] = jnp.zeros_like(acc_ref)

    # bf16 x bf16 -> f32 accumulation on the MXU
    acc_ref[...] += jnp.dot(a_ref[...], x_ref[...],
                            preferred_element_type=jnp.float32)

    @pl.when(k == pl.num_programs(1) - 1)
    def _():
        # (A@X)@W1 association: optimal here since c_in <= hidden.
        h = jnp.dot(acc_ref[...].astype(jnp.bfloat16), w1_ref[...],
                    preferred_element_type=jnp.float32) + b1_ref[...]
        # ReLU in f32, store H lane-dense in bf16 (halves HBM traffic for stage 2).
        h_ref[...] = jnp.maximum(h, 0.0).astype(h_ref.dtype)


def gcnconv(a_hat, x, w1, b1, *, node_tile=NODE_TILE):
    n_p = a_hat.shape[0]
    c_in_p = x.shape[1]
    h_p = w1.shape[1]
    ni = n_p // node_tile
    nk = n_p // node_tile

    flops = int(2 * n_p * n_p * c_in_p + 2 * n_p * c_in_p * h_p)
    bytes_accessed = int(a_hat.size * 2 + x.size * 2 + w1.size * 2
                         + b1.size * 4 + n_p * h_p * 2)

    return pl.pallas_call(
        gcnconv_kernel,
        out_shape=jax.ShapeDtypeStruct((n_p, h_p), jnp.bfloat16),
        grid=(ni, nk),
        in_specs=[
            pl.BlockSpec((node_tile, node_tile), lambda i, k: (i, k)),  # A_hat tile
            pl.BlockSpec((node_tile, c_in_p),    lambda i, k: (k, 0)),  # X tile
            pl.BlockSpec((c_in_p, h_p),          lambda i, k: (0, 0)),  # W1
            pl.BlockSpec((1, h_p),               lambda i, k: (0, 0)),  # b1 (f32)
        ],
        out_specs=pl.BlockSpec((node_tile, h_p), lambda i, k: (i, 0)),
        scratch_shapes=[pltpu.VMEM((node_tile, c_in_p), jnp.float32)],
        compiler_params=pltpu.CompilerParams(
            dimension_semantics=("parallel", "arbitrary"),
            vmem_limit_bytes=VMEM_LIMIT,
        ),
        cost_estimate=pl.CostEstimate(flops=flops, transcendentals=0,
                                      bytes_accessed=bytes_accessed),
    )(a_hat, x, w1, b1)


# -----------------------------------------------------------------------------
# Stage 2:  out = (P @ H) @ W_lin^T + b_lin
# grid = (node-col tiles k  [arbitrary/reduction]); lane-dense (G_P, C_OUT_P) out
# -----------------------------------------------------------------------------
def pool_linear_kernel(p_ref, h_ref, wl_ref, bl_ref, out_ref, acc_ref):
    k = pl.program_id(0)

    @pl.when(k == 0)
    def _():
        acc_ref[...] = jnp.zeros_like(acc_ref)

    acc_ref[...] += jnp.dot(p_ref[...], h_ref[...],
                            preferred_element_type=jnp.float32)

    @pl.when(k == pl.num_programs(0) - 1)
    def _():
        out_ref[...] = (jnp.dot(acc_ref[...].astype(jnp.bfloat16), wl_ref[...],
                                preferred_element_type=jnp.float32)
                        + bl_ref[...])


def pool_linear(pool, h, wl_t, bl, *, node_tile=NODE_TILE):
    g_p, n_p = pool.shape
    h_p = h.shape[1]
    c_out_p = wl_t.shape[1]
    nk = n_p // node_tile

    flops = int(2 * g_p * n_p * h_p + 2 * g_p * h_p * c_out_p)
    bytes_accessed = int(pool.size * 2 + h.size * 2 + wl_t.size * 2
                         + bl.size * 4 + g_p * c_out_p * 4)

    return pl.pallas_call(
        pool_linear_kernel,
        out_shape=jax.ShapeDtypeStruct((g_p, c_out_p), jnp.float32),
        grid=(nk,),
        in_specs=[
            pl.BlockSpec((g_p, node_tile), lambda k: (0, k)),  # pool tile
            pl.BlockSpec((node_tile, h_p), lambda k: (k, 0)),  # H tile
            pl.BlockSpec((h_p, c_out_p),   lambda k: (0, 0)),  # W_lin^T
            pl.BlockSpec((1, c_out_p),     lambda k: (0, 0)),  # b_lin (f32)
        ],
        out_specs=pl.BlockSpec((g_p, c_out_p), lambda k: (0, 0)),
        scratch_shapes=[pltpu.VMEM((g_p, h_p), jnp.float32)],
        compiler_params=pltpu.CompilerParams(
            dimension_semantics=("arbitrary",),
            vmem_limit_bytes=VMEM_LIMIT,
        ),
        cost_estimate=pl.CostEstimate(flops=flops, transcendentals=0,
                                      bytes_accessed=bytes_accessed),
    )(pool, h, wl_t, bl)


# -----------------------------------------------------------------------------
# Wrapper: pad to lane-dense / MXU-friendly shapes, cast operands to bf16,
# run the two kernels, slice back to logical shape.
# -----------------------------------------------------------------------------
def gcn_forward(a_hat, x, w1, b1, pool, w_lin, b_lin, *, node_tile=NODE_TILE):
    n = a_hat.shape[0]
    c_in = x.shape[1]
    hidden = w1.shape[1]
    g = pool.shape[0]
    c_out = w_lin.shape[0]

    n_p = _round_up(n, node_tile)
    c_in_p = _round_up(c_in, LANE)
    h_p = _round_up(hidden, LANE)
    c_out_p = _round_up(c_out, LANE)
    g_p = _round_up(g, SUBLANE)

    # bf16 matmul operands (halved DMA bytes, 2x MXU rate); biases stay f32,
    # accumulation is f32 inside the kernels. Zero padding is exact in bf16.
    a_p = _pad2d(a_hat, n_p, n_p).astype(jnp.bfloat16)
    x_p = _pad2d(x, n_p, c_in_p).astype(jnp.bfloat16)
    w1_p = _pad2d(w1, c_in_p, h_p).astype(jnp.bfloat16)
    b1_p = _pad2d(b1.reshape(1, -1), 1, h_p).astype(jnp.float32)
    pool_p = _pad2d(pool, g_p, n_p).astype(jnp.bfloat16)
    wl_p = _pad2d(w_lin.T, h_p, c_out_p).astype(jnp.bfloat16)
    bl_p = _pad2d(b_lin.reshape(1, -1), 1, c_out_p).astype(jnp.float32)

    h = gcnconv(a_p, x_p, w1_p, b1_p, node_tile=node_tile)
    out = pool_linear(pool_p, h, wl_p, bl_p, node_tile=node_tile)
    return out[:g, :c_out]


# -----------------------------------------------------------------------------
# Glue: dense normalized adjacency + mean-pool matrix (plain JAX)
# -----------------------------------------------------------------------------
def build_a_hat(edge_index, num_nodes):
    """Dense D^{-1/2}(A+I)D^{-1/2} as used by PyG GCNConv (default args).
    Note: duplicate edges accumulate, matching PyG message passing."""
    src, dst = edge_index[0], edge_index[1]
    adj = jnp.zeros((num_nodes, num_nodes), jnp.float32).at[dst, src].add(1.0)
    adj = adj + jnp.eye(num_nodes, dtype=jnp.float32)  # add self-loops
    deg = jnp.sum(adj, axis=1)
    dinv = jnp.where(deg > 0, 1.0 / jnp.sqrt(deg), 0.0)
    return dinv[:, None] * adj * dinv[None, :]


def build_pool(batch, num_graphs, num_nodes):
    """(num_graphs, num_nodes) matrix whose rows average the nodes of each graph."""
    onehot = (batch[None, :] == jnp.arange(num_graphs)[:, None]).astype(jnp.float32)
    counts = jnp.maximum(jnp.sum(onehot, axis=1, keepdims=True), 1.0)
    return onehot / counts


# -----------------------------------------------------------------------------
# Main
# -----------------------------------------------------------------------------
if __name__ == "__main__":
    # Small, deterministic problem
    num_nodes = 16
    in_channels = 8
    hidden_channels = 32
    out_channels = 4
    num_graphs = 2

    key = jax.random.PRNGKey(0)
    k_x, k_w1, k_wl, k_bl = jax.random.split(key, 4)

    # Node features (num_nodes, in_channels)
    x = jax.random.normal(k_x, (num_nodes, in_channels), jnp.float32)

    # Two ring graphs of 8 nodes each (deterministic edge_index, shape (2, E))
    ring = jnp.arange(8)
    src0, dst0 = ring, (ring + 1) % 8
    src = jnp.concatenate([src0, dst0, src0 + 8, dst0 + 8])
    dst = jnp.concatenate([dst0, src0, dst0 + 8, src0 + 8])
    edge_index = jnp.stack([src, dst]).astype(jnp.int32)

    # batch assignment: nodes 0..7 -> graph 0, nodes 8..15 -> graph 1
    batch = jnp.concatenate([jnp.zeros(8, jnp.int32), jnp.ones(8, jnp.int32)])

    # Deterministic parameters (GCNConv weight/bias + Linear weight/bias)
    w1 = jax.random.normal(k_w1, (in_channels, hidden_channels), jnp.float32) * 0.1
    b1 = jnp.zeros((hidden_channels,), jnp.float32)
    w_lin = jax.random.normal(k_wl, (out_channels, hidden_channels), jnp.float32) * 0.1
    b_lin = jax.random.normal(k_bl, (out_channels,), jnp.float32) * 0.1

    # Dense normalized adjacency + pooling matrix
    a_hat = build_a_hat(edge_index, num_nodes)
    pool = build_pool(batch, num_graphs, num_nodes)

    out = gcn_forward(a_hat, x, w1, b1, pool, w_lin, b_lin)
    out = jax.block_until_ready(out)

    # Pure-JAX f32 reference (kernel uses bf16 operands -> looser tolerance)
    ref_h = jnp.maximum(a_hat @ x @ w1 + b1[None, :], 0.0)
    ref = pool @ ref_h @ w_lin.T + b_lin[None, :]
    assert out.shape == (num_graphs, out_channels)
    max_err = float(jnp.max(jnp.abs(out - ref)))
    assert jnp.allclose(out, ref, atol=3e-2, rtol=3e-2), f"max_err={max_err}"

    print("KERNEL_OK")
</pallas_src>

<mosaic_0001>
module attributes {stable_mosaic.version = 11 : i64} {
  func.func @gcnconv_kernel(%arg0: i32, %arg1: i32, %arg2: memref<128x128xbf16, #tpu.memory_space<vmem>>, %arg3: memref<128x128xbf16, #tpu.memory_space<vmem>>, %arg4: memref<128x128xbf16, #tpu.memory_space<vmem>>, %arg5: memref<1x128xf32, #tpu.memory_space<vmem>>, %arg6: memref<128x128xbf16, #tpu.memory_space<vmem>>, %arg7: memref<128x128xf32, #tpu.memory_space<vmem>>) attributes {dimension_semantics = [#tpu.dimension_semantics<parallel>, #tpu.dimension_semantics<arbitrary>], iteration_bounds = array<i64: 1, 1>, scalar_prefetch = 0 : i64, scratch_operands = 1 : i64, tpu.core_type = #tpu.core_type<tc>, window_params = [{transform_indices = @transform_0, window_bounds = array<i64: 128, 128>}, {transform_indices = @transform_1, window_bounds = array<i64: 128, 128>}, {pipeline_mode = #tpu.pipeline_mode<synchronous>, transform_indices = @transform_2, window_bounds = array<i64: 128, 128>}, {pipeline_mode = #tpu.pipeline_mode<synchronous>, transform_indices = @transform_3, window_bounds = array<i64: 1, 128>}, {transform_indices = @transform_4, window_bounds = array<i64: 128, 128>}]} {
    %c0_i32 = arith.constant 0 : i32
    %0 = arith.cmpi eq, %arg1, %c0_i32 : i32
    %1 = arith.extui %0 : i1 to i32
    %c0_i32_0 = arith.constant 0 : i32
    %2 = arith.cmpi ne, %1, %c0_i32_0 : i32
    scf.if %2 {
      %cst_10 = arith.constant 0.000000e+00 : f32
      %12 = vector.broadcast %cst_10 : f32 to vector<128x128xf32>
      %c0_11 = arith.constant 0 : index
      %c0_12 = arith.constant 0 : index
      %13 = vector.load %arg7[%c0_11, %c0_12] : memref<128x128xf32, #tpu.memory_space<vmem>>, vector<128x128xf32>
      tpu.vector_store %arg7[%c0_11, %c0_12], %12 {strides = array<i32>} : memref<128x128xf32, #tpu.memory_space<vmem>>, vector<128x128xf32>,
    } else {
    }
    %c0 = arith.constant 0 : index
    %c0_1 = arith.constant 0 : index
    %3 = vector.load %arg7[%c0, %c0_1] : memref<128x128xf32, #tpu.memory_space<vmem>>, vector<128x128xf32>
    %c0_2 = arith.constant 0 : index
    %c0_3 = arith.constant 0 : index
    %4 = vector.load %arg2[%c0_2, %c0_3] : memref<128x128xbf16, #tpu.memory_space<vmem>>, vector<128x128xbf16>
    %c0_4 = arith.constant 0 : index
    %c0_5 = arith.constant 0 : index
    %5 = vector.load %arg3[%c0_4, %c0_5] : memref<128x128xbf16, #tpu.memory_space<vmem>>, vector<128x128xbf16>
    %cst = arith.constant dense<0.000000e+00> : vector<128x128xf32>
    %6 = tpu.matmul %4, %5, %cst {dimension_numbers = #tpu.dot_dimension_numbers<[1], [0], [0], [1], [0, 0, 1, 1], [], []>} : vector<128x128xbf16>, vector<128x128xbf16>, vector<128x128xf32> -> vector<128x128xf32>
    %7 = arith.addf %3, %6 : vector<128x128xf32>
    %c0_6 = arith.constant 0 : index
    %c0_7 = arith.constant 0 : index
    %8 = vector.load %arg7[%c0_6, %c0_7] : memref<128x128xf32, #tpu.memory_space<vmem>>, vector<128x128xf32>
    tpu.vector_store %arg7[%c0_6, %c0_7], %7 {strides = array<i32>} : memref<128x128xf32, #tpu.memory_space<vmem>>, vector<128x128xf32>,
    %c0_i32_8 = arith.constant 0 : i32
    %9 = arith.cmpi eq, %arg1, %c0_i32_8 : i32
    %10 = arith.extui %9 : i1 to i32
    %c0_i32_9 = arith.constant 0 : i32
    %11 = arith.cmpi ne, %10, %c0_i32_9 : i32
    scf.if %11 {
      %c0_10 = arith.constant 0 : index
      %c0_11 = arith.constant 0 : index
      %12 = vector.load %arg7[%c0_10, %c0_11] : memref<128x128xf32, #tpu.memory_space<vmem>>, vector<128x128xf32>
      %13 = arith.truncf %12 : vector<128x128xf32> to vector<128x128xbf16>
      %c0_12 = arith.constant 0 : index
      %c0_13 = arith.constant 0 : index
      %14 = vector.load %arg4[%c0_12, %c0_13] : memref<128x128xbf16, #tpu.memory_space<vmem>>, vector<128x128xbf16>
      %cst_14 = arith.constant dense<0.000000e+00> : vector<128x128xf32>
      %15 = tpu.matmul %13, %14, %cst_14 {dimension_numbers = #tpu.dot_dimension_numbers<[1], [0], [0], [1], [0, 0, 1, 1], [], []>} : vector<128x128xbf16>, vector<128x128xbf16>, vector<128x128xf32> -> vector<128x128xf32>
      %c0_15 = arith.constant 0 : index
      %c0_16 = arith.constant 0 : index
      %16 = vector.load %arg5[%c0_15, %c0_16] : memref<1x128xf32, #tpu.memory_space<vmem>>, vector<1x128xf32>
      %17 = vector.broadcast %16 : vector<1x128xf32> to vector<128x128xf32>
      %18 = arith.addf %15, %17 : vector<128x128xf32>
      %cst_17 = arith.constant 0.000000e+00 : f32
      %19 = vector.broadcast %cst_17 : f32 to vector<128x128xf32>
      %20 = arith.maximumf %18, %19 : vector<128x128xf32>
      %21 = arith.truncf %20 : vector<128x128xf32> to vector<128x128xbf16>
      %c0_18 = arith.constant 0 : index
      %c0_19 = arith.constant 0 : index
      %22 = vector.load %arg6[%c0_18, %c0_19] : memref<128x128xbf16, #tpu.memory_space<vmem>>, vector<128x128xbf16>
      tpu.vector_store %arg6[%c0_18, %c0_19], %21 {strides = array<i32>} : memref<128x128xbf16, #tpu.memory_space<vmem>>, vector<128x128xbf16>,
    } else {
    }
    return
  }
  func.func @transform_0(%arg0: i32, %arg1: i32) -> (i32, i32) {
    %c0_i32 = arith.constant 0 : i32
    return %arg0, %arg1 : i32, i32
  }
  func.func @transform_1(%arg0: i32, %arg1: i32) -> (i32, i32) {
    %c0_i32 = arith.constant 0 : i32
    %c0_i32_0 = arith.constant 0 : i32
    return %arg1, %c0_i32 : i32, i32
  }
  func.func @transform_2(%arg0: i32, %arg1: i32) -> (i32, i32) {
    %c0_i32 = arith.constant 0 : i32
    %c0_i32_0 = arith.constant 0 : i32
    %c0_i32_1 = arith.constant 0 : i32
    return %c0_i32, %c0_i32_0 : i32, i32
  }
  func.func @transform_3(%arg0: i32, %arg1: i32) -> (i32, i32) {
    %c0_i32 = arith.constant 0 : i32
    %c0_i32_0 = arith.constant 0 : i32
    %c0_i32_1 = arith.constant 0 : i32
    return %c0_i32, %c0_i32_0 : i32, i32
  }
  func.func @transform_4(%arg0: i32, %arg1: i32) -> (i32, i32) {
    %c0_i32 = arith.constant 0 : i32
    %c0_i32_0 = arith.constant 0 : i32
    return %arg0, %c0_i32 : i32, i32
  }
}

</mosaic_0001>

<bundles_post_ra>
// kernel: tpu_custom_call.1
= control target key start
LH: loop header
LB: loop body
LE: loop exit
PB: predicated region body
PF: predicated region fallthrough
CT: control target
= control target key end

     0   :  { %9 = vsyncpa [#allocation4], 0  ;;  %s1036_s0 = inlined_call_operand.hbm [shape: bf16[128,128], index: 0, kind: input, shape index: {}]   ;;  %s1037_s1 = inlined_call_operand.hbm [shape: bf16[128,128], index: 1, kind: input, shape index: {}]   ;;  %s1038_s2 = inlined_call_operand.hbm [shape: bf16[128,128], index: 2, kind: input, shape index: {}]   ;;  %s1039_s3 = inlined_call_operand.vmem [shape: f32[1,128], index: 3, kind: input, shape index: {}]   ;;  %s1040_s4 = inlined_call_operand.hbm [shape: bf16[128,128], index: 4, kind: output, shape index: {}]  }
   0x1   :  { %10 = vsyncpa [#allocation7], 0 }
   0x2   :  { %11 = vsyncpa [#allocation5], 0  ;;  %s978_s15 = smov [#allocation6]   ;;  %s979_s17 = smov [#allocation3]  }
   0x3   :  { %s29_s16 = sshll.u32 %s978_s15, 4  ;;  %s17_s18 = sshll.u32 %s979_s17, 4  ;;  %s30_s16 = int_to_ptr.vmem [resolvable:$true] %s29_s16  ;;  %s18_s18 = int_to_ptr.vmem [resolvable:$true] %s17_s18 }
   0x4   :  { %s900_s19 = scalar_lea.vmem %s30_s16, 1024  ;;  %p905_p1 = scmp.lt.s32.totalorder %s30_s16, %s30_s16 }
   0x5   :  { %p901_p0 = scmp.ne.s32.totalorder %s30_s16, %s900_s19  ;;  %p906_p2 = scmp.lt.s32.totalorder %s900_s19, %s900_s19 }
   0x7   :  { %p907_p3 = por %p906_p2, %p905_p1 }
   0x9   :  { %p908_p4 = pnand %p907_p3, %p901_p0 }
   0xb   :  { %911 = shalt.err (!%p908_p4)
}
   0xc   :  { %s980_s20 = smov 64   ;;  %s981_s21 = smov 4  }
   0xd   :  { %35 = dma.hbm_to_vmem [thread:$0]  %s1037_s1, 1024, %s30_s16, [#allocation7], %s980_s20, %s980_s20, %s981_s21  }
   0xe   :  { %s920_s24 = scalar_lea.vmem %s18_s18, 1024  ;;  %p925_p6 = scmp.lt.s32.totalorder %s18_s18, %s18_s18 }
   0xf   :  { %p921_p5 = scmp.ne.s32.totalorder %s18_s18, %s920_s24  ;;  %p926_p7 = scmp.lt.s32.totalorder %s920_s24, %s920_s24 }
  0x11   :  { %p927_p8 = por %p926_p7, %p925_p6 }
  0x13   :  { %p928_p9 = pnand %p927_p8, %p921_p5 }
  0x15   :  { %931 = shalt.err (!%p928_p9)
}
  0x16   :  { %23 = dma.hbm_to_vmem [thread:$0]  %s1036_s0, 1024, %s18_s18, [#allocation4], %s980_s20, %s980_s20, %s981_s21  }
  0x17   :  { %s982_s27 = smov [#allocation8]  }
  0x18   :  { %s41_s28 = sshll.u32 %s982_s27, 4  ;;  %s42_s28 = int_to_ptr.vmem [resolvable:$true] %s41_s28 }
  0x19   :  { %s940_s29 = scalar_lea.vmem %s42_s28, 1024  ;;  %p945_p11 = scmp.lt.s32.totalorder %s42_s28, %s42_s28 }
  0x1a   :  { %p941_p10 = scmp.ne.s32.totalorder %s42_s28, %s940_s29  ;;  %p946_p12 = scmp.lt.s32.totalorder %s940_s29, %s940_s29 }
  0x1c   :  { %p947_p13 = por %p946_p12, %p945_p11 }
  0x1e   :  { %p948_p0 = pnand %p947_p13, %p941_p10 }
  0x20   :  { %951 = shalt.err (!%p948_p0)
}
  0x21   :  { %47 = dma.hbm_to_vmem [thread:$0]  %s1038_s2, 1024, %s42_s28, [#allocation7], %s980_s20, %s980_s20, %s981_s21  }
  0x22   :  { %972 = dma.done.wait [#allocation4], 1024  }
  0x23   :  { %973 = vsyncadd [#allocation4], 4294966272 }
  0x24   :  { %974 = dma.done.wait [#allocation7], 2048  }
  0x25   :  { %975 = vsyncadd [#allocation7], 4294965248  ;;  %v868_v0 = vld [vmem:[#allocation6 + $0x38] sm:$0xff]   ;;  %v869_v1 = vld [vmem:[#allocation6 + $0x30] sm:$0xff]  }
  0x26   :  { %798 = vmatprep.subr.bf16.mxu0 %v868_v0  ;;  %v870_v2 = vld [vmem:[#allocation6 + $0x28] sm:$0xff]   ;;  %v871_v3 = vld [vmem:[#allocation6 + $0x20] sm:$0xff]   ;;  %v872_v5 = vld [vmem:[#allocation6 + $0x18] sm:$0xff]  }
  0x27   :  { %799 = vmatpush3.bf16.msra.mxu0 %v868_v0  ;;  %v876_v4 = vld [vmem:[#allocation3] sm:$0xff]   ;;  %v873_v6 = vld [vmem:[#allocation6 + $0x10] sm:$0xff]   ;;  %v884_v7 = vld [vmem:[#allocation8 + $0x38] sm:$0xff]  }
  0x28   :  { %800 = vmatprep.subr.bf16.mxu0 %v869_v1  ;;  %814 = vmatprep.mubr.bf16.mxu0 %v876_v4  ;;  %v885_v8 = vld [vmem:[#allocation8 + $0x30] sm:$0xff]   ;;  %v874_v9 = vld [vmem:[#allocation6 + $0x8] sm:$0xff]   ;;  %v875_v11 = vld [vmem:[#allocation6] sm:$0xff]  }
  0x29   :  { %830 = vmatprep.subr.bf16.mxu1 %v884_v7  ;;  %v886_v10 = vld [vmem:[#allocation8 + $0x28] sm:$0xff]   ;;  %v887_v12 = vld [vmem:[#allocation8 + $0x20] sm:$0xff]   ;;  %v888_v13 = vld [vmem:[#allocation8 + $0x18] sm:$0xff]  }
  0x2a   :  { %831 = vmatpush3.bf16.msra.mxu1 %v884_v7  ;;  %v877_v14 = vld [vmem:[#allocation3 + $0x8] sm:$0xff]   ;;  %v878_v15 = vld [vmem:[#allocation3 + $0x10] sm:$0xff]   ;;  %v879_v17 = vld [vmem:[#allocation3 + $0x18] sm:$0xff]  }
  0x2b   :  { %801 = vmatpush3.bf16.msra.mxu0 %v869_v1  ;;  %832 = vmatprep.subr.bf16.mxu1 %v885_v8  ;;  %v889_v16 = vld [vmem:[#allocation8 + $0x10] sm:$0xff]   ;;  %v880_v18 = vld [vmem:[#allocation3 + $0x20] sm:$0xff]   ;;  %v881_v19 = vld [vmem:[#allocation3 + $0x28] sm:$0xff]  }
  0x2c   :  { %802 = vmatprep.subr.bf16.mxu0 %v870_v2  ;;  %v882_v20 = vld [vmem:[#allocation3 + $0x30] sm:$0xff]   ;;  %v883_v21 = vld [vmem:[#allocation3 + $0x38] sm:$0xff]   ;;  %v890_v22 = vld [vmem:[#allocation8 + $0x8] sm:$0xff]  }
  0x2d   :  { %v891_v23 = vld [vmem:[#allocation8] sm:$0xff]  }
  0x2e   :  { %833 = vmatpush3.bf16.msra.mxu1 %v885_v8  ;;  %v678_v49 = vld [vmem:[%s1039_s3] ss:$0 sm:$0xff]  ;;  %s983_s3 = smov [#allocation9]  }
  0x2f   :  { %803 = vmatpush3.bf16.msra.mxu0 %v870_v2  ;;  %834 = vmatprep.subr.bf16.mxu1 %v886_v10  ;;  %s649_s5 = sshll.u32 %s983_s3, 4  ;;  %s650_s5 = int_to_ptr.vmem [resolvable:$true] %s649_s5 }
  0x30   :  { %804 = vmatprep.subr.bf16.mxu0 %v871_v3  ;;  %s952_s6 = scalar_lea.vmem %s650_s5, 1024  ;;  %p957_p2 = scmp.lt.s32.totalorder %s650_s5, %s650_s5 }
  0x31   :  { %p953_p1 = scmp.ne.s32.totalorder %s650_s5, %s952_s6  ;;  %p958_p3 = scmp.lt.s32.totalorder %s952_s6, %s952_s6 }
  0x32   :  { %835 = vmatpush3.bf16.msra.mxu1 %v886_v10 }
  0x33   :  { %805 = vmatpush3.bf16.msra.mxu0 %v871_v3  ;;  %836 = vmatprep.subr.bf16.mxu1 %v887_v12  ;;  %p959_p4 = por %p958_p3, %p957_p2 }
  0x34   :  { %806 = vmatprep.subr.bf16.mxu0 %v872_v5 }
  0x35   :  { %p960_p5 = pnand %p959_p4, %p953_p1 }
  0x36   :  { %837 = vmatpush3.bf16.msra.mxu1 %v887_v12 }
  0x37   :  { %807 = vmatpush3.bf16.msra.mxu0 %v872_v5  ;;  %838 = vmatprep.subr.bf16.mxu1 %v888_v13 }
  0x38   :  { %808 = vmatprep.subr.bf16.mxu0 %v873_v6 }
  0x3a   :  { %839 = vmatpush3.bf16.msra.mxu1 %v888_v13 }
  0x3b   :  { %809 = vmatpush3.bf16.msra.mxu0 %v873_v6  ;;  %840 = vmatprep.subr.bf16.mxu1 %v889_v16 }
  0x3c   :  { %810 = vmatprep.subr.bf16.mxu0 %v874_v9 }
  0x3e   :  { %841 = vmatpush3.bf16.msra.mxu1 %v889_v16 }
  0x3f   :  { %811 = vmatpush3.bf16.msra.mxu0 %v874_v9  ;;  %842 = vmatprep.subr.bf16.mxu1 %v890_v22 }
  0x40   :  { %812 = vmatprep.subr.bf16.mxu0 %v875_v11 }
  0x42   :  { %843 = vmatpush3.bf16.msra.mxu1 %v890_v22 }
  0x43   :  { %813 = vmatpush3.bf16.msra.mxu0 %v875_v11  ;;  %844 = vmatprep.subr.bf16.mxu1 %v891_v23 }
  0x46   :  { %815 = vmatmul.mubr.bf16.vlgmr.msra.gmra.mxu0 %v877_v14  ;;  %845 = vmatpush3.bf16.msra.mxu1 %v891_v23 }
  0x47   :  { %818 = vmatprep.mubr.bf16.mxu0 %v878_v15 }
  0x4e   :  { %819 = vmatmul.mubr.bf16.gmra.mxu0 %v879_v17 }
  0x4f   :  { %822 = vmatprep.mubr.bf16.mxu0 %v880_v18 }
  0x56   :  { %823 = vmatmul.mubr.bf16.gmra.mxu0 %v881_v19 }
  0x57   :  { %826 = vmatprep.mubr.bf16.mxu0 %v882_v20 }
  0x5e   :  { %827 = vmatmul.mubr.bf16.gmra.mxu0 %v883_v21 }
 0x106   :  { %v816_v24 = vpop.f32.mrf.mxu0 }
 0x108   :  { %v258_v25 = vpop.f32.mrf.mxu0 }
 0x10a   :  { %v817_v26 = vpop.f32.mrf.mxu0 }
 0x10b   :  { %v373_v29 = vpack.c.bf16 %v817_v26, %v816_v24 }
 0x10c   :  { %v261_v27 = vpop.f32.mrf.mxu0 }
 0x10d   :  { %v372_v28 = vpack.c.bf16 %v261_v27, %v258_v25 }
 0x10e   :  { %v820_v30 = vpop.f32.mrf.mxu0 }
 0x10f   :  { %846 = vmatprep.mubr.bf16.mxu1 %v372_v28 }
 0x110   :  { %v274_v31 = vpop.f32.mrf.mxu0  ;;  %847 = vmatmul.mubr.bf16.vlgmr.msra.gmra.mxu1 %v373_v29 }
 0x112   :  { %v821_v32 = vpop.f32.mrf.mxu0 }
 0x113   :  { %v375_v35 = vpack.c.bf16 %v821_v32, %v820_v30 }
 0x114   :  { %v277_v33 = vpop.f32.mrf.mxu0 }
 0x115   :  { %v374_v34 = vpack.c.bf16 %v277_v33, %v274_v31 }
 0x116   :  { %v824_v36 = vpop.f32.mrf.mxu0 }
 0x117   :  { %850 = vmatprep.mubr.bf16.mxu1 %v374_v34 }
 0x118   :  { %v290_v37 = vpop.f32.mrf.mxu0  ;;  %851 = vmatmul.mubr.bf16.gmra.mxu1 %v375_v35 }
 0x11a   :  { %v825_v38 = vpop.f32.mrf.mxu0 }
 0x11b   :  { %v377_v41 = vpack.c.bf16 %v825_v38, %v824_v36 }
 0x11c   :  { %v293_v39 = vpop.f32.mrf.mxu0 }
 0x11d   :  { %v376_v40 = vpack.c.bf16 %v293_v39, %v290_v37 }
 0x11e   :  { %v828_v42 = vpop.f32.mrf.mxu0 }
 0x11f   :  { %854 = vmatprep.mubr.bf16.mxu1 %v376_v40 }
 0x120   :  { %v306_v43 = vpop.f32.mrf.mxu0  ;;  %855 = vmatmul.mubr.bf16.gmra.mxu1 %v377_v41 }
 0x122   :  { %v829_v44 = vpop.f32.mrf.mxu0 }
 0x123   :  { %v379_v47 = vpack.c.bf16 %v829_v44, %v828_v42 }
 0x124   :  { %v309_v45 = vpop.f32.mrf.mxu0 }
 0x125   :  { %v378_v46 = vpack.c.bf16 %v309_v45, %v306_v43 }
 0x127   :  { %858 = vmatprep.mubr.bf16.mxu1 %v378_v46 }
 0x128   :  { %859 = vmatmul.mubr.bf16.gmra.mxu1 %v379_v47 }
 0x1d0   :  { %v848_v48 = vpop.f32.mrf.mxu1 }
 0x1d1   :  { %v494_v51 = vadd.f32 %v848_v48, %v678_v49 }
 0x1d2   :  { %v485_v50 = vpop.f32.mrf.mxu1 }
 0x1d3   :  { %v486_v53 = vadd.f32 %v678_v49, %v485_v50  ;;  %v550_v56 = vmax.f32 %v494_v51, 0.0 }
 0x1d4   :  { %v849_v52 = vpop.f32.mrf.mxu1 }
 0x1d5   :  { %v497_v54 = vadd.f32 %v849_v52, %v678_v49  ;;  %v548_v60 = vmax.f32 %v486_v53, 0.0 }
 0x1d6   :  { %v488_v55 = vpop.f32.mrf.mxu1 }
 0x1d7   :  { %v551_v57 = vmax.f32 %v497_v54, 0.0  ;;  %v489_v58 = vadd.f32 %v678_v49, %v488_v55 }
 0x1d8   :  { %v852_v59 = vpop.f32.mrf.mxu1 }
 0x1d9   :  { %v727_v61 = vpack.c.bf16 %v551_v57, %v550_v56  ;;  %v549_v62 = vmax.f32 %v489_v58, 0.0  ;;  %v510_v1 = vadd.f32 %v852_v59, %v678_v49 }
 0x1da   :  { %v501_v63 = vpop.f32.mrf.mxu1 }
 0x1db   :  { %759 = vst [vmem:[#allocation9 + $0x8] sm:$0xff] %v727_v61   ;;  %v722_v0 = vpack.c.bf16 %v549_v62, %v548_v60  ;;  %v502_v3 = vadd.f32 %v678_v49, %v501_v63  ;;  %v554_v6 = vmax.f32 %v510_v1, 0.0 }
 0x1dc   :  { %v853_v2 = vpop.f32.mrf.mxu1 }
 0x1dd   :  { %723 = vst [vmem:[#allocation9] sm:$0xff] %v722_v0   ;;  %v513_v4 = vadd.f32 %v853_v2, %v678_v49  ;;  %v552_v10 = vmax.f32 %v502_v3, 0.0 }
 0x1de   :  { %v504_v5 = vpop.f32.mrf.mxu1 }
 0x1df   :  { %v555_v7 = vmax.f32 %v513_v4, 0.0  ;;  %v505_v8 = vadd.f32 %v678_v49, %v504_v5 }
 0x1e0   :  { %v856_v9 = vpop.f32.mrf.mxu1 }
 0x1e1   :  { %v737_v11 = vpack.c.bf16 %v555_v7, %v554_v6  ;;  %v553_v12 = vmax.f32 %v505_v8, 0.0  ;;  %v526_v15 = vadd.f32 %v856_v9, %v678_v49 }
 0x1e2   :  { %v517_v13 = vpop.f32.mrf.mxu1 }
 0x1e3   :  { %761 = vst [vmem:[#allocation9 + $0x18] sm:$0xff] %v737_v11   ;;  %v732_v14 = vpack.c.bf16 %v553_v12, %v552_v10  ;;  %v518_v17 = vadd.f32 %v678_v49, %v517_v13  ;;  %v558_v20 = vmax.f32 %v526_v15, 0.0 }
 0x1e4   :  { %v857_v16 = vpop.f32.mrf.mxu1 }
 0x1e5   :  { %760 = vst [vmem:[#allocation9 + $0x10] sm:$0xff] %v732_v14   ;;  %v529_v18 = vadd.f32 %v857_v16, %v678_v49  ;;  %v556_v24 = vmax.f32 %v518_v17, 0.0 }
 0x1e6   :  { %v520_v19 = vpop.f32.mrf.mxu1 }
 0x1e7   :  { %v559_v21 = vmax.f32 %v529_v18, 0.0  ;;  %v521_v22 = vadd.f32 %v678_v49, %v520_v19 }
 0x1e8   :  { %v860_v23 = vpop.f32.mrf.mxu1 }
 0x1e9   :  { %v747_v25 = vpack.c.bf16 %v559_v21, %v558_v20  ;;  %v557_v26 = vmax.f32 %v521_v22, 0.0  ;;  %v542_v29 = vadd.f32 %v860_v23, %v678_v49 }
 0x1ea   :  { %v533_v27 = vpop.f32.mrf.mxu1 }
 0x1eb   :  { %763 = vst [vmem:[#allocation9 + $0x28] sm:$0xff] %v747_v25   ;;  %v742_v28 = vpack.c.bf16 %v557_v26, %v556_v24  ;;  %v534_v31 = vadd.f32 %v678_v49, %v533_v27  ;;  %v562_v34 = vmax.f32 %v542_v29, 0.0 }
 0x1ec   :  { %v861_v30 = vpop.f32.mrf.mxu1 }
 0x1ed   :  { %762 = vst [vmem:[#allocation9 + $0x20] sm:$0xff] %v742_v28   ;;  %v545_v32 = vadd.f32 %v861_v30, %v678_v49  ;;  %v560_v37 = vmax.f32 %v534_v31, 0.0 }
 0x1ee   :  { %v536_v33 = vpop.f32.mrf.mxu1 }
 0x1ef   :  { %v563_v35 = vmax.f32 %v545_v32, 0.0  ;;  %v537_v36 = vadd.f32 %v678_v49, %v536_v33 }
 0x1f1   :  { %v757_v38 = vpack.c.bf16 %v563_v35, %v562_v34  ;;  %v561_v39 = vmax.f32 %v537_v36, 0.0 }
 0x1f3   :  { %765 = vst [vmem:[#allocation9 + $0x38] sm:$0xff] %v757_v38   ;;  %v752_v40 = vpack.c.bf16 %v561_v39, %v560_v37 }
 0x1f5   :  { %764 = vst [vmem:[#allocation9 + $0x30] sm:$0xff] %v752_v40  }
 0x1f6   :  { %963 = shalt.err (!%p960_p5)
}
 0x1f7   :  { %655 = dma.vmem_to_hbm [thread:$0]  %s650_s5, 1024, %s1040_s4, [#allocation5], %s980_s20, %s980_s20, %s981_s21  }
 0x1f8   :  { %976 = dma.done.wait [#allocation5], 1024  }
 0x1f9   :  { %977 = vsyncadd [#allocation5], 4294966272 }
 0x1fa   :  { %659 = vsyncpa [#allocation4], 1 }
 0x1fb   :  { %660 = vsyncpa [#allocation7], 1 }
 0x1fc   :  { %661 = vsyncpa [#allocation5], 1 }

</bundles_post_ra>
